<compile_context>
chip_gen: v5e
topology: v5e:2x2
jax: 0.10.0
libtpu: 0.0.40
codegen_flags: <defaults>
</compile_context>

<pallas_src>
import functools
import math

import jax
import jax.numpy as jnp
import numpy as np
from jax.experimental import pallas as pl
from jax.experimental.pallas import tpu as pltpu

D = 2
KSIZE = 9  # 3**d
# Unique (i, j) operator pairs with i <= j (q_ij is symmetric since Kinv is).
_PAIRS = tuple((i, j) for j in range(KSIZE) for i in range(j + 1))
NPAIRS = len(_PAIRS)  # 45


def _softplus(x):
    return math.log1p(math.exp(x))


# Deterministic "learned" scalar parameters (same init values as the torch module).
_GP_LS = _softplus(-1.0)        # RBF.length_scale   = softplus(-1.0)
_GP_SCALE = _softplus(-1.0)     # RBF.scale          = softplus(-1.0)
_BLUR_LS = _softplus(-3.0)      # blur lengthscale   = softplus(-3.0)
_OPIK_LS = math.sqrt(_GP_LS ** 2 + _BLUR_LS ** 2)            # blurred ls (opiK)
_OPIKOPJ_LS = math.sqrt(_GP_LS ** 2 + 2.0 * _BLUR_LS ** 2)   # double-blurred ls

# Constant divides pre-folded into reciprocal multiplies (Python floats).
_GP_LS2 = _GP_LS * _GP_LS
_KXX_INV_2LS2 = 0.5 / _GP_LS2
_KXX_NORM = _GP_SCALE / (2.0 * math.pi * _GP_LS2)
_OPIK_S2 = _OPIK_LS * _OPIK_LS
_OPIK_INV_S2 = 1.0 / _OPIK_S2
_OPIK_INV_2S2 = 0.5 * _OPIK_INV_S2
_OPIK_INV_S4 = _OPIK_INV_S2 * _OPIK_INV_S2
_OPIK_NORM = _GP_SCALE / (2.0 * math.pi * _OPIK_S2)


def _tiling_config():
    """(row-tile cap, scoped vmem_limit_bytes), generation-aware.

    128 MiB parts (v5e/v6e): cap=512, ~100 MiB scoped limit (don't leave half idle).
    64  MiB parts (v7x):     cap=256, 48 MiB scoped limit (headroom under physical).
    """
    vmem_bytes = 64 * 1024 * 1024  # conservative default (v7x-sized)
    try:
        info = pltpu.get_tpu_info()
        vmem_bytes = int(getattr(info, "vmem_capacity_bytes", vmem_bytes) or vmem_bytes)
    except Exception:
        pass
    if vmem_bytes >= 96 * 1024 * 1024:
        return 512, 100 * 1024 * 1024
    return 256, 48 * 1024 * 1024


def _choose_tile(dim, cap):
    """Largest row tile <= cap dividing dim; prefers multiples of 128, then 8."""
    if dim <= cap:
        return dim
    for align in (128, 8):
        for t in range((cap // align) * align, 0, -align):
            if dim % t == 0:
                return t
    return dim  # rare non-8-divisible size: keep the whole axis resident


# ---------------------------------------------------------------------------
# Kernel 1: Kxxs = K(x_in, x_in) + diag(mean(sigin,-1)^2), row-tiled over n.
# ---------------------------------------------------------------------------
def _kxxs_kernel(x_in_ref, x_in_t_ref, sigin_ref, out_ref, *, tn):
    row0 = pl.program_id(1) * tn
    xi = x_in_ref[0]           # (tn, 2)
    xit = x_in_t_ref[0]        # (2, n)
    s = sigin_ref[0]           # (tn, cin)
    n = xit.shape[1]

    dx = xi[:, 0:1] - xit[0:1, :]
    dy = xi[:, 1:2] - xit[1:2, :]
    k = _KXX_NORM * jnp.exp(-(dx * dx + dy * dy) * _KXX_INV_2LS2)

    sig2 = jnp.mean(s, axis=1, keepdims=True) ** 2                 # (tn, 1)
    r = jax.lax.broadcasted_iota(jnp.int32, (tn, n), 0) + row0
    c = jax.lax.broadcasted_iota(jnp.int32, (tn, n), 1)
    out_ref[0] = jnp.where(r == c, k + sig2, k)


# ---------------------------------------------------------------------------
# Kernel 2: main GP hot path, tiled over (batch, m-tiles).
# ---------------------------------------------------------------------------
def _gp_kernel(x_out_ref, x_in_t_ref, f_ref, kinv_ref, w_flat_ref, bias_ref,
               aat_sym_ref, base_ref, mu_ref, sig_ref, stack_ref, *, tm):
    xo = x_out_ref[0]          # (tm, 2)
    xit = x_in_t_ref[0]        # (2, n)
    f = f_ref[0]               # (n, cin)

    dx = xo[:, 0:1] - xit[0:1, :]                                   # (tm, n)
    dy = xo[:, 1:2] - xit[1:2, :]                                   # (tm, n)
    kval = _OPIK_NORM * jnp.exp(-(dx * dx + dy * dy) * _OPIK_INV_2S2)

    # opiK_{3*ix+iy} recomputed on demand from dx/dy/kval so only three (tm, n)
    # f32 temporaries need to stay live across the kernel (VMEM hygiene, v7x);
    # recomputation is 1-2 cheap VPU multiplies under the MXU.
    def op_factor(ix, iy):
        if ix == 0:
            fx = kval
        elif ix == 1:
            fx = (-dx * _OPIK_INV_S2) * kval
        else:
            fx = (dx * dx * _OPIK_INV_S4 - _OPIK_INV_S2) * kval
        if iy == 1:
            fx = fx * (-dy * _OPIK_INV_S2)
        elif iy == 2:
            fx = fx * (dy * dy * _OPIK_INV_S4 - _OPIK_INV_S2)
        return fx

    # Stack the 9 opiK slices (k = 3*ix + iy) directly in the matmul dtype
    # (bf16 by default: half the scratch footprint and half the vst bytes).
    for kk in range(KSIZE):
        ix, iy = divmod(kk, 3)
        stack_ref[kk * tm:(kk + 1) * tm, :] = op_factor(ix, iy).astype(stack_ref.dtype)

    # A = opiK @ Kxxs^-1 : one (9*tm, n) @ (n, n) MXU matmul, f32 accumulation.
    a_stack = jnp.dot(stack_ref[...], kinv_ref[0],
                      preferred_element_type=jnp.float32)           # (9*tm, n) f32

    # kf = A @ f, then the nn.Linear(cin*9 -> cout) is folded into a SINGLE
    # (tm, 9*cin) @ (9*cin, cout) matmul by lane-concatenating the 9 kf blocks
    # (column order (k, ci) matches w_flat built in the wrapper).
    kf = jnp.dot(a_stack, f, preferred_element_type=jnp.float32)    # (9*tm, cin)
    kf_cat = jnp.concatenate(
        [kf[k * tm:(k + 1) * tm, :] for k in range(KSIZE)], axis=1)  # (tm, 9*cin)
    mu = jnp.dot(kf_cat, w_flat_ref[...],
                 preferred_element_type=jnp.float32) + bias_ref[...]  # (tm, cout)

    # gp_var = base - sum_{i,j} aat[i,j] * (A_i . opiK_j along n).
    # q_ij == q_ji (Kinv symmetric): only the 45 i<=j pairs are reduced, packed
    # into a lane-dense (tm, 45) matrix and combined with the pre-scaled
    # symmetric AAT table by ONE (tm,45)@(45,cout) matmul (moves 45 broadcast
    # FMAs off the VPU). Pair order must match _PAIRS used in the wrapper.
    q_cols = []
    for j in range(KSIZE):
        jx, jy = divmod(j, 3)
        o_j = op_factor(jx, jy)
        for i in range(j + 1):
            a_i = a_stack[i * tm:(i + 1) * tm, :]
            q_cols.append(jnp.sum(a_i * o_j, axis=1, keepdims=True))  # (tm, 1)
    q_cat = jnp.concatenate(q_cols, axis=1)                           # (tm, 45)
    var_sub = jnp.dot(q_cat, aat_sym_ref[...],
                      preferred_element_type=jnp.float32)             # (tm, cout)
    gp_var = base_ref[...] - var_sub
    sig = jnp.sqrt(jnp.maximum(gp_var + 1e-6, 1e-6))

    # Lane-dense output layout (cout, tm); the wrapper transposes back.
    mu_ref[0] = mu.T
    sig_ref[0] = sig.T


# ---------------------------------------------------------------------------
# Wrapper (glue: tiling choices, parameter reshapes, Cholesky-based inverse)
# ---------------------------------------------------------------------------
def linear_operator_gp_forward(x, weight, bias, xout=None, matmul_in_bf16=True):
    coordsin, meanin, stdin, ids = x
    bs, n, d = coordsin.shape
    assert d == 2, "this implementation is d=2 (ksize=9)"
    cin = meanin.shape[-1]
    cout = weight.shape[0]
    coordsout = coordsin if xout is None else xout
    m = coordsout.shape[1]

    cap, vmem_limit = _tiling_config()
    x_in_t = jnp.swapaxes(coordsin, 1, 2)                     # (bs, d, n)

    # Kxxs in Pallas (row-tiled), then a jittered Cholesky solve for the inverse.
    tn = _choose_tile(n, cap)
    kxxs = pl.pallas_call(
        functools.partial(_kxxs_kernel, tn=tn),
        out_shape=jax.ShapeDtypeStruct((bs, n, n), jnp.float32),
        grid=(bs, n // tn),
        in_specs=[pl.BlockSpec((1, tn, d), lambda b, t: (b, t, 0)),
                  pl.BlockSpec((1, d, n), lambda b, t: (b, 0, 0)),
                  pl.BlockSpec((1, tn, cin), lambda b, t: (b, t, 0))],
        out_specs=pl.BlockSpec((1, tn, n), lambda b, t: (b, t, 0)),
        compiler_params=pltpu.CompilerParams(
            dimension_semantics=("parallel", "parallel"),
            vmem_limit_bytes=vmem_limit),
    )(coordsin, x_in_t, stdin)

    # TODO(synk): gpytorch's approximate Kxxs.root_inv_decomposition (Lanczos/CG,
    # max 20 iters) has no clean Pallas equivalent; use a jittered Cholesky solve
    # (more stable than a dense inverse) for the exact quantity it approximates.
    eye = jnp.eye(n, dtype=jnp.float32)
    chol = jnp.linalg.cholesky(kxxs + 1e-6 * eye)
    eye_b = jnp.broadcast_to(eye, (bs, n, n))
    y = jax.lax.linalg.triangular_solve(chol, eye_b, left_side=True, lower=True)
    kinv = jax.lax.linalg.triangular_solve(chol, y, left_side=True, lower=True,
                                           transpose_a=True)
    kinv = 0.5 * (kinv + jnp.swapaxes(kinv, 1, 2))            # exact symmetry
    mm_dtype = jnp.bfloat16 if matmul_in_bf16 else jnp.float32
    kinv = kinv.astype(mm_dtype)                              # halves kinv DMA/VMEM

    # Parameter preprocessing (glue). weight[co, ci*9 + k] -> w_flat[(k*cin+ci), co]
    # (row order (k, ci) matches the in-kernel lane-concat of the 9 kf blocks).
    w3 = weight.reshape(cout, cin, KSIZE).astype(jnp.float32)
    w_flat = jnp.transpose(w3, (2, 1, 0)).reshape(KSIZE * cin, cout)  # (9*cin, cout)
    aat = jnp.einsum('oci,ocj->oij', w3, w3).reshape(cout, KSIZE * KSIZE).T
    aat = aat.astype(jnp.float32)                                     # (81, cout)
    bias2d = bias.reshape(1, cout).astype(jnp.float32)

    # opiKopj diagonal at delta=0 is data-independent; fold kxxij @ AAT into a
    # (1, cout) constant computed once in the wrapper.
    s2 = _OPIKOPJ_LS ** 2
    dxxp = np.array([[1.0, 0.0, -1.0 / s2],
                     [0.0, 1.0 / s2, 0.0],
                     [-1.0 / s2, 0.0, 3.0 / (s2 * s2)]], dtype=np.float64)
    k0 = _GP_SCALE / (2.0 * math.pi * s2)
    kxxij = np.einsum('ab,cd->acbd', dxxp, dxxp).reshape(1, KSIZE * KSIZE) * k0
    base2d = jnp.asarray(kxxij, jnp.float32) @ aat                    # (1, cout)

    # Symmetric AAT table for the 45 unique (i<=j) pairs (off-diagonals doubled).
    aat_sym = jnp.stack(
        [(1.0 if i == j else 2.0) * aat[i * KSIZE + j] for (i, j) in _PAIRS],
        axis=0)                                                       # (45, cout)

    tm = _choose_tile(m, cap)
    # v7x has 2 TensorCores: keep at least 2 parallel grid steps so one TC isn't idle.
    while bs * (m // tm) < 2 and tm >= 256 and m % (tm // 2) == 0:
        tm //= 2

    mu_t, sig_t = pl.pallas_call(
        functools.partial(_gp_kernel, tm=tm),
        out_shape=(jax.ShapeDtypeStruct((bs, cout, m), jnp.float32),
                   jax.ShapeDtypeStruct((bs, cout, m), jnp.float32)),
        grid=(bs, m // tm),
        in_specs=[pl.BlockSpec((1, tm, d), lambda b, t: (b, t, 0)),
                  pl.BlockSpec((1, d, n), lambda b, t: (b, 0, 0)),
                  pl.BlockSpec((1, n, cin), lambda b, t: (b, 0, 0)),
                  # kinv/f block index depends only on b; single-buffering them
                  # (pl.Buffered(1)) would reclaim ~2*n^2 bytes on v7x but is left
                  # at the portable default double-buffering here.
                  pl.BlockSpec((1, n, n), lambda b, t: (b, 0, 0)),
                  pl.BlockSpec((KSIZE * cin, cout), lambda b, t: (0, 0)),
                  pl.BlockSpec((1, cout), lambda b, t: (0, 0)),
                  pl.BlockSpec((NPAIRS, cout), lambda b, t: (0, 0)),
                  pl.BlockSpec((1, cout), lambda b, t: (0, 0))],
        out_specs=(pl.BlockSpec((1, cout, tm), lambda b, t: (b, 0, t)),
                   pl.BlockSpec((1, cout, tm), lambda b, t: (b, 0, t))),
        scratch_shapes=[pltpu.VMEM((KSIZE * tm, n), mm_dtype)],
        compiler_params=pltpu.CompilerParams(
            dimension_semantics=("parallel", "parallel"),
            vmem_limit_bytes=vmem_limit),
    )(coordsout, x_in_t, meanin, kinv, w_flat, bias2d, aat_sym, base2d)

    mu = jnp.swapaxes(mu_t, 1, 2)           # back to (bs, m, cout)
    sigout = jnp.swapaxes(sig_t, 1, 2)
    return coordsout, mu, sigout, ids


if __name__ == "__main__":
    bs, n, d, cin, cout = 2, 16, 2, 4, 8
    key = jax.random.PRNGKey(0)
    k1, k2, k3, k4, k5 = jax.random.split(key, 5)

    coordsin = jax.random.uniform(k1, (bs, n, d), jnp.float32)              # (bs, n, d)
    meanin = jax.random.normal(k2, (bs, n, cin), jnp.float32)               # f
    stdin = 0.1 + 0.05 * jax.random.uniform(k3, (bs, n, cin), jnp.float32)  # sigin > 0
    ids = jnp.arange(bs * n, dtype=jnp.int32).reshape(bs, n)

    # op_linear = nn.Linear(cin*ksize, cout): deterministic uniform(-1/sqrt(fan), ...)
    fan_in = cin * KSIZE
    bound = 1.0 / math.sqrt(fan_in)
    weight = jax.random.uniform(k4, (cout, fan_in), jnp.float32, -bound, bound)
    bias = jax.random.uniform(k5, (cout,), jnp.float32, -bound, bound)

    coordsout, mu, sigout, ids_out = linear_operator_gp_forward(
        (coordsin, meanin, stdin, ids), weight, bias)
    jax.block_until_ready((coordsout, mu, sigout, ids_out))

    assert coordsout.shape == (bs, n, d)
    assert mu.shape == (bs, n, cout) and sigout.shape == (bs, n, cout)
    assert bool(jnp.all(jnp.isfinite(mu))) and bool(jnp.all(jnp.isfinite(sigout)))
    assert bool(jnp.all(sigout > 0.0))
    print("KERNEL_OK")
</pallas_src>

<mosaic_0001>
module attributes {stable_mosaic.version = 11 : i64} {
  func.func @_kxxs_kernel(%arg0: i32, %arg1: i32, %arg2: memref<1x16x2xf32, #tpu.memory_space<vmem>>, %arg3: memref<1x2x16xf32, #tpu.memory_space<vmem>>, %arg4: memref<1x16x4xf32, #tpu.memory_space<vmem>>, %arg5: memref<1x16x16xf32, #tpu.memory_space<vmem>>) attributes {dimension_semantics = [#tpu.dimension_semantics<parallel>, #tpu.dimension_semantics<parallel>], iteration_bounds = array<i64: 2, 1>, scalar_prefetch = 0 : i64, scratch_operands = 0 : i64, tpu.core_type = #tpu.core_type<tc>, window_params = [{transform_indices = @transform_0, window_bounds = array<i64: 1, 16, 2>}, {transform_indices = @transform_1, window_bounds = array<i64: 1, 2, 16>}, {transform_indices = @transform_2, window_bounds = array<i64: 1, 16, 4>}, {transform_indices = @transform_3, window_bounds = array<i64: 1, 16, 16>}]} {
    %c16_i32 = arith.constant 16 : i32
    %0 = arith.muli %arg1, %c16_i32 : i32
    %c0 = arith.constant 0 : index
    %c0_0 = arith.constant 0 : index
    %c0_1 = arith.constant 0 : index
    %1 = vector.load %arg2[%c0, %c0_0, %c0_1] : memref<1x16x2xf32, #tpu.memory_space<vmem>>, vector<1x16x2xf32>
    %2 = vector.shape_cast %1 : vector<1x16x2xf32> to vector<16x2xf32>
    %c0_2 = arith.constant 0 : index
    %c0_3 = arith.constant 0 : index
    %c0_4 = arith.constant 0 : index
    %3 = vector.load %arg3[%c0_2, %c0_3, %c0_4] : memref<1x2x16xf32, #tpu.memory_space<vmem>>, vector<1x2x16xf32>
    %4 = vector.shape_cast %3 : vector<1x2x16xf32> to vector<2x16xf32>
    %c0_5 = arith.constant 0 : index
    %c0_6 = arith.constant 0 : index
    %c0_7 = arith.constant 0 : index
    %5 = vector.load %arg4[%c0_5, %c0_6, %c0_7] : memref<1x16x4xf32, #tpu.memory_space<vmem>>, vector<1x16x4xf32>
    %6 = vector.shape_cast %5 : vector<1x16x4xf32> to vector<16x4xf32>
    %7 = vector.extract_strided_slice %2 {offsets = [0, 0], sizes = [16, 1], strides = [1, 1]} : vector<16x2xf32> to vector<16x1xf32>
    %8 = vector.extract_strided_slice %4 {offsets = [0, 0], sizes = [1, 16], strides = [1, 1]} : vector<2x16xf32> to vector<1x16xf32>
    %9 = vector.broadcast %7 : vector<16x1xf32> to vector<16x16xf32>
    %10 = vector.broadcast %8 : vector<1x16xf32> to vector<16x16xf32>
    %11 = arith.subf %9, %10 : vector<16x16xf32>
    %12 = vector.extract_strided_slice %2 {offsets = [0, 1], sizes = [16, 1], strides = [1, 1]} : vector<16x2xf32> to vector<16x1xf32>
    %13 = vector.extract_strided_slice %4 {offsets = [1, 0], sizes = [1, 16], strides = [1, 1]} : vector<2x16xf32> to vector<1x16xf32>
    %14 = vector.broadcast %12 : vector<16x1xf32> to vector<16x16xf32>
    %15 = vector.broadcast %13 : vector<1x16xf32> to vector<16x16xf32>
    %16 = arith.subf %14, %15 : vector<16x16xf32>
    %17 = arith.mulf %11, %11 : vector<16x16xf32>
    %18 = arith.mulf %16, %16 : vector<16x16xf32>
    %19 = arith.addf %17, %18 : vector<16x16xf32>
    %cst = arith.constant 0.000000e+00 : f32
    %20 = vector.broadcast %cst : f32 to vector<16x16xf32>
    %21 = arith.subf %20, %19 : vector<16x16xf32>
    %cst_8 = arith.constant 5.09513187 : f32
    %22 = vector.broadcast %cst_8 : f32 to vector<16x16xf32>
    %23 = arith.mulf %21, %22 : vector<16x16xf32>
    %24 = math.exp %23 : vector<16x16xf32>
    %cst_9 = arith.constant 0.508057475 : f32
    %25 = vector.broadcast %cst_9 : f32 to vector<16x16xf32>
    %26 = arith.mulf %25, %24 : vector<16x16xf32>
    %cst_10 = arith.constant dense<0.000000e+00> : vector<16xf32>
    %27 = vector.multi_reduction <add>, %6, %cst_10 [1] : vector<16x4xf32> to vector<16xf32>
    %28 = vector.shape_cast %27 : vector<16xf32> to vector<16x1xf32>
    %cst_11 = arith.constant 4.000000e+00 : f32
    %29 = vector.broadcast %cst_11 : f32 to vector<16x1xf32>
    %30 = arith.divf %28, %29 : vector<16x1xf32>
    %31 = arith.mulf %30, %30 : vector<16x1xf32>
    %32 = tpu.iota {dimensions = array<i32: 0>} : vector<16x16xi32>
    %33 = vector.broadcast %0 : i32 to vector<16x16xi32>
    %34 = arith.addi %32, %33 : vector<16x16xi32>
    %35 = tpu.iota {dimensions = array<i32: 1>} : vector<16x16xi32>
    %36 = arith.cmpi eq, %34, %35 : vector<16x16xi32>
    %37 = vector.broadcast %31 : vector<16x1xf32> to vector<16x16xf32>
    %38 = arith.addf %26, %37 : vector<16x16xf32>
    %39 = arith.select %36, %38, %26 : vector<16x16xi1>, vector<16x16xf32>
    %c0_12 = arith.constant 0 : index
    %c0_13 = arith.constant 0 : index
    %c0_14 = arith.constant 0 : index
    %40 = vector.load %arg5[%c0_12, %c0_13, %c0_14] : memref<1x16x16xf32, #tpu.memory_space<vmem>>, vector<1x16x16xf32>
    %41 = vector.shape_cast %40 : vector<1x16x16xf32> to vector<16x16xf32>
    %42 = vector.shape_cast %39 : vector<16x16xf32> to vector<1x16x16xf32>
    tpu.vector_store %arg5[%c0_12, %c0_13, %c0_14], %42 {strides = array<i32>} : memref<1x16x16xf32, #tpu.memory_space<vmem>>, vector<1x16x16xf32>,
    return
  }
  func.func @transform_0(%arg0: i32, %arg1: i32) -> (i32, i32, i32) {
    %c0_i32 = arith.constant 0 : i32
    %c0_i32_0 = arith.constant 0 : i32
    return %arg0, %arg1, %c0_i32 : i32, i32, i32
  }
  func.func @transform_1(%arg0: i32, %arg1: i32) -> (i32, i32, i32) {
    %c0_i32 = arith.constant 0 : i32
    %c0_i32_0 = arith.constant 0 : i32
    %c0_i32_1 = arith.constant 0 : i32
    return %arg0, %c0_i32, %c0_i32_0 : i32, i32, i32
  }
  func.func @transform_2(%arg0: i32, %arg1: i32) -> (i32, i32, i32) {
    %c0_i32 = arith.constant 0 : i32
    %c0_i32_0 = arith.constant 0 : i32
    return %arg0, %arg1, %c0_i32 : i32, i32, i32
  }
  func.func @transform_3(%arg0: i32, %arg1: i32) -> (i32, i32, i32) {
    %c0_i32 = arith.constant 0 : i32
    %c0_i32_0 = arith.constant 0 : i32
    return %arg0, %arg1, %c0_i32 : i32, i32, i32
  }
}

</mosaic_0001>

<bundles_post_ra>
// kernel: tpu_custom_call.1
= control target key start
LH: loop header
LB: loop body
LE: loop exit
PB: predicated region body
PF: predicated region fallthrough
CT: control target
= control target key end

     0   :  { %8 = vsyncpa [#allocation3], 0  ;;  %s763_s0 = inlined_call_operand.vmem [shape: f32[2,16,2], index: 0, kind: input, shape index: {}]   ;;  %s764_s1 = inlined_call_operand.vmem [shape: f32[2,2,16], index: 1, kind: input, shape index: {}]   ;;  %s765_s2 = inlined_call_operand.vmem [shape: f32[2,16,4], index: 2, kind: input, shape index: {}]   ;;  %s766_s3 = inlined_call_operand.hbm [shape: f32[2,16,16], index: 3, kind: output, shape index: {}]  }
   0x1   :  { %10 = vsyncpa [#allocation3 + $0x1], 0  ;;  %s654_s12 = smov 0   ;;  %s656_s13 = smov 0  }
   0x2   :  { %s658_s14 = smov 0   ;;  %s660_s15 = smov 0  }
   0x3   :  { %s662_s16 = smov 0   ;;  %s664_s17 = smov 0  }
   0x4 LB: > { %s461_s18 = sadd.s32 4294967295, %s627_s17   ;;  %s462_s19 = sadd.s32 4294967294, %s627_s17   ;;  %s627_s17 = sphi %s664_s17, %s16_s17   ;;  %s623_s16 = sphi %s662_s16, %s773_s16   ;;  %s619_s15 = sphi %s660_s15, %s772_s15   ;;  %s615_s14 = sphi %s658_s14, %s771_s14   ;;  %s611_s13 = sphi %s656_s13, %s770_s13   ;;  %s607_s12 = sphi %s654_s12, %s769_s12  }
   0x5   : > { %s28_s20 = sadd.s32 1, %s623_s16  ;;  %s119_s21 = sadd.s32 1, %s615_s14 }
   0x6   : > { %p30_p0 = scmp.ge.s32.totalorder %s28_s20, 2  ;;  %p129_p1 = scmp.ne.s32.totalorder %s615_s14, %s611_s13 }
   0x7   : > { %p130_p2 = scmp.eq.s32.totalorder %s461_s18, 1  ;;  %p135_p3 = scmp.ne.s32.totalorder %s611_s13, %s607_s12 }
   0x8   : > { %s775_s20 = smov (%p30_p0, %s28_s20), 0  ;;  %p136_p5 = scmp.eq.s32.totalorder %s462_s19, 1 }
   0x9   : > { %p694_p4 = por %p130_p2, %p129_p1  ;;  %s114_s23 = ssub.s32 %s623_s16, %s775_s20 }
   0xa   : > { %p465_p6 = scmp.ge.s32.totalorder %s627_s17, 1  ;;  %p117_p7 = scmp.eq.s32.totalorder %s114_s23, 0 }
   0xb   : > { %p701_p8 = por %p136_p5, %p135_p3  ;;  %p187_p9 = scmp.lt.s32.totalorder %s627_s17, 3 }
   0xc   : > { %s707_s25 = scalar_select %p117_p7, %s615_s14, %s119_s21  }
   0xd   : > { %p188_p10 = pnand %p465_p6, %p187_p9 }
   0xe   : > { %p229_p11 = scmp.lt.s32.totalorder (!%p188_p10), %s619_s15, 1  ;;  %s225_s11 = sand.u32 (!%p188_p10), 1, %s611_s13  }
   0xf   : > { %191 = sbr.rel (%p188_p10) target bundleno = 176 (0xb0), region = 32  ;;  %s466_s18 = sshll.u32 (!%p188_p10), %s225_s11, 4 }
  0x10   : > { %s479_s19 = sshll.u32 (!%p188_p10), %s619_s15, 4 }
  0x14   : > { %v629_v0 = vmov 1   ;;  %v630_v1 = vmov 0   ;;  %s230_s26 = scalar_select %p229_p11, %s619_s15, 1  ;;  %vm299_vm0 = vcmask 31744   ;;  %v631_v8 = vmov 4.0  }
  0x15   : > { %541 = vset.pattern.permute.xlu1 %v629_v0  ;;  %540 = vset.pattern.permute.xlu0 %v630_v1  ;;  %543 = vrcp.f32 %v631_v8  ;;  %v317_v36 = vlaneseq  ;;  %vm331_vm3 = vcmask 130048   ;;  %s335_s15 = scalar_lea.sflag [#allocation3], %s225_s11 }
  0x16   : > { %s477_s27 = sshll.u32 %s230_s26, 4  ;;  %s469_s7 = sshll.u32 %s230_s26, 1 }
  0x17   : > { %s236_s30 = scalar_lea.vmem %s763_s0, %s477_s27  ;;  %s250_s6 = scalar_lea.vmem %s765_s2, %s477_s27  ;;  %v318_v40 = vshrl.u32 %v317_v36, 7  ;;  %v324_v41 = vand.u32 127, %v317_v36 }
  0x18   : > { %v254_v2 = vld [vmem:[%s236_s30] sm:$0xff]  ;;  %v258_v5 = vld [vmem:[%s250_s6 + $0x8] sm:$0xff]  ;;  %s241_s10 = scalar_lea.vmem %s764_s1, %s469_s7  ;;  %s348_s26 = scalar_lea.hbm %s766_s3, %s479_s19 }
  0x19   : > { %v257_v3 = vld [vmem:[%s250_s6] sm:$0xff]  ;;  %273 = vperm.xlu1 %541, %v254_v2   ;;  %261 = vperm.xlu0 %540, %v254_v2   ;;  %v255_v6 = vld [vmem:[%s236_s30 + $0x8] sm:$0xff]  ;;  %v303_v7 = vsel %vm299_vm0, %v258_v5, 0.0  ;;  %vm325_vm2 = vcmp.eq.s32.totalorder %v318_v40, %v324_v41  ;;  %s227_s27 = scalar_lea.vmem [#allocation2], %s466_s18  ;;  %v319_v50 = vadd.s32 8, %v318_v40  ;;  %s351_s29 = sshll.u32 %s348_s26, 4  ;;  %s352_s29 = int_to_ptr.hbm [resolvable:$true] %s351_s29 }
  0x1a   : > { %v300_v4 = vsel %vm299_vm0, %v257_v3, 0.0  ;;  %v256_v10 = vld [vmem:[%s241_s10] sm:$0x3]  ;;  %s349_s28 = sshll.u32 %s227_s27, 4  ;;  %s563_s30 = sshra.s32 %s352_s29, 4  ;;  %s350_s28 = int_to_ptr.vmem [resolvable:$true] %s349_s28  ;;  %s564_s30 = int_to_ptr.hbm [resolvable:$true] %s563_s30 }
  0x1b   : > { %301 = vadd.xlane.f32.xlu2 %v300_v4  ;;  %v544_v9 = vpop.eup %543  ;;  %v280_v12 = vperm.slane %v256_v10, 1  ;;  %v269_v13 = vperm.slane %v256_v10, 0  ;;  %vm326_vm4 = vcmp.eq.s32.totalorder %v319_v50, %v324_v41  ;;  %s565_s4 = scalar_lea.hbm %s564_s30, 16  ;;  %s569_s7 = scalar_lea.hbm %s766_s3, 32 }
  0x1c   : > { %v307_v11 = vmul.f32 4.0, %v544_v9  ;;  %vm311_vm1 = vweird.f32 %v544_v9  ;;  %p566_p12 = scmp.ne.s32.totalorder %s564_s30, %s565_s4  ;;  %p570_p1 = scmp.lt.s32.totalorder %s564_s30, %s766_s3 }
  0x1d   : > { %p571_p2 = scmp.lt.s32.totalorder %s569_s7, %s565_s4 }
  0x1e   : > { %v308_v14 = vsub.f32 1.0, %v307_v11  ;;  %p567_p13 = pnand %p566_p12, %p694_p4 }
  0x1f   : > { %p572_p3 = por %p571_p2, %p570_p1 }
  0x20   : > { %v309_v21 = vmul.f32 %v544_v9, %v308_v14  ;;  %p568_p0 = pneg %p567_p13 }
  0x21   : > { %277 = vperm.xlu1 %541, %v255_v6   ;;  %266 = vperm.xlu0 %540, %v255_v6  }
  0x22   : > { %v310_v24 = vadd.f32 %v544_v9, %v309_v21  ;;  %p573_p5 = pnand %p572_p3, %p568_p0 }
  0x23   : > { %304 = vadd.xlane.f32.xlu2 %v303_v7 }
  0x24   : > { %v312_v34 = vsel %vm311_vm1, %v544_v9, %v310_v24 }
  0x29   : > { %542 = vset.pattern.permute.xlu0 %v629_v0 }
  0x8b   : > { %v274_v15 = vpop.permute.xlu1 %273  ;;  %v262_v16 = vpop.permute.xlu0 %261 }
  0x8c   : > { %v281_v17 = vsub.f32 %v274_v15, %v280_v12  ;;  %v270_v18 = vsub.f32 %v262_v16, %v269_v13 }
  0x8e   : > { %v285_v19 = vmul.f32 %v281_v17, %v281_v17  ;;  %v283_v20 = vmul.f32 %v270_v18, %v270_v18  ;;  %v302_v30 = vpop.xlane.xlu2 %301 }
  0x8f   : > { %v313_v37 = vmul.f32 %v312_v34, %v302_v30 }
  0x90   : > { %v287_v22 = vadd.f32 %v285_v19, %v283_v20 }
  0x91   : > { %v315_v42 = vmul.f32 %v313_v37, %v313_v37 }
  0x92   : > { %v289_v23 = vsub.f32 0.0, %v287_v22 }
  0x93   : > { %v278_v25 = vpop.permute.xlu1 %277  ;;  %v267_v26 = vpop.permute.xlu0 %266 }
  0x94   : > { %v291_v27 = vmul.f32 5.095132, %v289_v23  ;;  %v282_v28 = vsub.f32 %v278_v25, %v280_v12  ;;  %v271_v29 = vsub.f32 %v267_v26, %v269_v13 }
  0x96   : > { %v293_v31 = vmul.f32 1.442695, %v291_v27  ;;  %v286_v32 = vmul.f32 %v282_v28, %v282_v28  ;;  %v284_v33 = vmul.f32 %v271_v29, %v271_v29  ;;  %v305_v45 = vpop.xlane.xlu2 %304 }
  0x97   : > { %v314_v48 = vmul.f32 %v312_v34, %v305_v45 }
  0x98   : > { %545 = vpow2.f32 %v293_v31  ;;  %v288_v35 = vadd.f32 %v286_v32, %v284_v33 }
  0x99   : > { %v316_v51 = vmul.f32 %v314_v48, %v314_v48 }
  0x9a   : > { %v290_v38 = vsub.f32 0.0, %v288_v35 }
  0x9c   : > { %v292_v39 = vmul.f32 5.095132, %v290_v38 }
  0x9e   : > { %v546_v43 = vpop.eup %545  ;;  %v295_v44 = vmul.f32 1.442695, %v292_v39 }
  0x9f   : > { %v297_v46 = vmul.f32 0.5080575, %v546_v43 }
  0xa0   : > { %547 = vpow2.f32 %v295_v44 }
  0xa1   : > { %v327_v47 = vadd.f32 %v315_v42, %v297_v46 }
  0xa3   : > { %v329_v49 = vsel %vm325_vm2, %v327_v47, %v297_v46 }
  0xa4   : > { %332 = vst.msk [vmem:[%s227_s27] sm:$0xff] %vm331_vm3, %v329_v49 }
  0xa6   : > { %v548_v52 = vpop.eup %547 }
  0xa7   : > { %v298_v53 = vmul.f32 0.5080575, %v548_v52 }
  0xa9   : > { %v328_v54 = vadd.f32 %v316_v51, %v298_v53 }
  0xab   : > { %v330_v55 = vsel %vm326_vm4, %v328_v54, %v298_v53 }
  0xac   : > { %333 = vst.msk [vmem:[%s227_s27 + $0x8] sm:$0xff] %vm331_vm3, %v330_v55 }
  0xad   : > { %576 = shalt.err (!%p573_p5)
}
  0xae   : > { %s632_s10 = smov 128   ;;  %s633_s11 = smov 8  }
  0xaf   : > { %480 = dma.vmem_to_hbm [thread:$0]  (%p694_p4), %s350_s28, 256, %s352_s29, %s335_s15, %s632_s10, %s632_s10, %s633_s11  }
  0xb0 PF: > { %p486_p6 = scmp.ge.s32.totalorder %s627_s17, 2  ;;  %s366_s18 = sand.u32 1, %s607_s12  }
  0xb1   : > { %s367_s19 = scalar_lea.sflag [#allocation3], %s366_s18 }
  0xb2   : > { %p483_p7 = pnand %p486_p6, %p701_p8 }
  0xb4   : > { %p484_p9 = pneg %p483_p7 }
  0xb6   : > { %602 = dma.done.wait (%p484_p9), %s367_s19, 256  }
  0xb7   : > { %604 = vsyncadd (%p484_p9), %s367_s19, 4294967040  ;;  %s16_s17 = sadd.s32 1, %s627_s17   ;;  %s769_s12 = smov %s611_s13 }
  0xb8   : > { %p13_p10 = scmp.ge.s32.totalorder %s16_s17, 4   ;;  %s770_s13 = smov %s615_s14 }
  0xb9   : > { %s771_s14 = smov %s707_s25  ;;  %s772_s15 = smov %s623_s16 }
  0xba   : > { %s773_s16 = smov %s775_s20  ;;  %15 = sbr.rel (!%p13_p10) target bundleno = 4 (0x4), region = 73 }
  0xbf   :  { %373 = vsyncpa [#allocation3], 1 }
  0xc0   :  { %375 = vsyncpa [#allocation3 + $0x1], 1 }

</bundles_post_ra>
